<compile_context>
chip_gen: v5e
topology: v5e:2x2
jax: 0.10.0
libtpu: 0.0.40
codegen_flags: <defaults>
</compile_context>

<pallas_src>
import functools

import jax
import jax.numpy as jnp
from jax.experimental import pallas as pl
from jax.experimental.pallas import tpu as pltpu


def _round_up(n, m):
    return ((n + m - 1) // m) * m


def _rfm_kernel(x_ref, w_ref, b_ref, o_ref, *, use_mxu):
    x = x_ref[...].astype(jnp.float32)               # (tm, K)
    w = w_ref[...].astype(jnp.float32)               # (K, J_pad)
    b = b_ref[...]                                   # (1, J_pad)

    if use_mxu:
        # K >= 4: one MXU pass over the contraction (K-padding is free filler,
        # the kernel is HBM/EUP-bound).
        h = jnp.dot(x, w, preferred_element_type=jnp.float32)
        h = h + b
    else:
        # Tiny K (e.g. in_features == 1): broadcast multiply-accumulate on the
        # VPU, bias folded into the accumulator init (saves one full pass).
        h = b + x[:, 0:1] * w[0:1, :]                # (tm, 1)*(1, J) -> (tm, J)
        for k in range(1, x.shape[1]):               # static unroll, K <= 3
            h = h + x[:, k:k + 1] * w[k:k + 1, :]

    o_ref[...] = jnp.tanh(h).astype(o_ref.dtype)     # EUP tanh, lane-dense store


def rfm_rep_forward(x, weight_t, bias, a, x_0, *,
                    max_tile_m=8192, out_dtype=None):
    """Pallas implementation of RFM_rep.forward.

    x:        (N, in_features) float32
    weight_t: (in_features, J_n) float32   (transpose of PyTorch's weight)
    bias:     (1, J_n) float32
    a, x_0:   affine rescale scalars
    returns:  (N, J_n) in out_dtype (default: x.dtype)
    """
    N, K = x.shape
    Kw, J = weight_t.shape
    assert Kw == K and bias.shape == (1, J)
    out_dtype = x.dtype if out_dtype is None else out_dtype

    # Host-side fold of the affine rescale into the linear layer (tiny op,
    # no recompile when a / x_0 change):
    #   a*(x - x0) @ Wt + b == x @ (a*Wt) + (b - a*x0 * Wt.sum(0))
    a = jnp.asarray(a, jnp.float32)
    x_0 = jnp.asarray(x_0, jnp.float32)
    w_eff = (a * weight_t).astype(jnp.float32)
    b_eff = (bias - a * x_0 * jnp.sum(weight_t, axis=0, keepdims=True)
             ).astype(jnp.float32)

    # Lane-dense output: pad J to a multiple of 128 (zero columns -> tanh(0)=0,
    # sliced off below; no padding/slicing at all when J is already aligned).
    J_pad = _round_up(J, 128)
    if J_pad != J:
        w_eff = jnp.pad(w_eff, ((0, 0), (0, J_pad - J)))
        b_eff = jnp.pad(b_eff, ((0, 0), (0, J_pad - J)))

    # Generation-aware VMEM budget (v5e/v6e: 128 MiB, v7x: 64 MiB per TC).
    try:
        vmem_cap = int(pltpu.get_tpu_info().vmem_capacity_bytes)
    except Exception:  # pragma: no cover - conservative fallback
        vmem_cap = 64 << 20
    vmem_budget = int(0.6 * vmem_cap)

    # Tile-size selection: biggest row tile that fits the budget
    # (double-buffered x + out blocks, plus resident weight/bias, f32).
    bytes_per_row = 2 * (K + J_pad) * 4
    weight_bytes = 2 * (K * J_pad + J_pad) * 4
    avail = max(vmem_budget - weight_bytes, 8 * bytes_per_row)
    tile_m = max(8, (avail // bytes_per_row) // 8 * 8)
    tile_m = min(tile_m, max_tile_m, _round_up(N, 8))
    # Ensure >= 2 grid steps when possible so v7x's two TensorCores both get
    # work (negligible extra per-step overhead on single-TC v5e/v6e).
    if N > 8:
        tile_m = min(tile_m, _round_up(pl.cdiv(N, 2), 8))
    grid_m = pl.cdiv(N, tile_m)  # partial last block handled by Pallas masking

    use_mxu = K >= 4
    kernel = functools.partial(_rfm_kernel, use_mxu=use_mxu)

    vmem_need = weight_bytes + 2 * tile_m * (K + J_pad) * 4
    vmem_limit = int(min(max(2 * vmem_need, 8 << 20), int(0.85 * vmem_cap)))

    out = pl.pallas_call(
        kernel,
        out_shape=jax.ShapeDtypeStruct((N, J_pad), out_dtype),
        grid_spec=pltpu.PrefetchScalarGridSpec(
            num_scalar_prefetch=0,
            grid=(grid_m,),
            in_specs=[
                pl.BlockSpec((tile_m, K), lambda i: (i, 0)),   # x block
                pl.BlockSpec((K, J_pad), lambda i: (0, 0)),    # folded weight
                pl.BlockSpec((1, J_pad), lambda i: (0, 0)),    # folded bias
            ],
            out_specs=pl.BlockSpec((tile_m, J_pad), lambda i: (i, 0)),
        ),
        compiler_params=pltpu.CompilerParams(
            dimension_semantics=("parallel",),
            vmem_limit_bytes=vmem_limit),
    )(x, w_eff, b_eff)

    if J_pad != J:
        out = out[:, :J]
    return out


if __name__ == "__main__":
    key = jax.random.PRNGKey(0)

    def run_case(key, in_features, J_n, N, x_min, x_max):
        a = 2.0 / (x_max - x_min)
        x_0 = (x_max + x_min) / 2.0
        k_x, k_w, k_b = jax.random.split(key, 3)

        # Mimic nn.Linear's uniform(-1/sqrt(in), 1/sqrt(in)) init.
        bound = 1.0 / (in_features ** 0.5)
        weight = jax.random.uniform(k_w, (J_n, in_features), jnp.float32,
                                    -bound, bound)
        bias = jax.random.uniform(k_b, (J_n,), jnp.float32, -bound, bound)
        x = jax.random.uniform(k_x, (N, in_features), jnp.float32, x_min, x_max)

        weight_t = weight.T                  # (in_features, J_n)
        bias2d = bias.reshape(1, J_n)        # (1, J_n)

        out = rfm_rep_forward(x, weight_t, bias2d, a, x_0)
        out = jax.block_until_ready(out)

        # Reference in plain JAX (same math as the PyTorch module).
        ref = jnp.tanh((a * (x - x_0)) @ weight_t + bias2d)
        assert out.shape == (N, J_n)
        assert jnp.allclose(out, ref, atol=1e-5, rtol=1e-5)

    k1, k2 = jax.random.split(key)
    # Case 1: module-typical shapes (1D Helmholtz -> in_features = 1), N not a
    # multiple of the tile to exercise the masked partial last block.
    run_case(k1, in_features=1, J_n=128, N=200, x_min=0.0, x_max=1.0)
    # Case 2: MXU path (K >= 4) + J padding/slicing path.
    run_case(k2, in_features=8, J_n=64, N=50, x_min=-1.0, x_max=3.0)

    print("KERNEL_OK")
</pallas_src>

<mosaic_0001>
module attributes {stable_mosaic.version = 11 : i64} {
  func.func @_rfm_kernel(%arg0: i32, %arg1: memref<104x1xf32, #tpu.memory_space<vmem>>, %arg2: memref<1x128xf32, #tpu.memory_space<vmem>>, %arg3: memref<1x128xf32, #tpu.memory_space<vmem>>, %arg4: memref<104x128xf32, #tpu.memory_space<vmem>>) attributes {dimension_semantics = [#tpu.dimension_semantics<parallel>], iteration_bounds = array<i64: 2>, scalar_prefetch = 0 : i64, scratch_operands = 0 : i64, tpu.core_type = #tpu.core_type<tc>, window_params = [{transform_indices = @transform_0, window_bounds = array<i64: 104, 1>}, {pipeline_mode = #tpu.pipeline_mode<synchronous>, transform_indices = @transform_1, window_bounds = array<i64: 1, 128>}, {pipeline_mode = #tpu.pipeline_mode<synchronous>, transform_indices = @transform_2, window_bounds = array<i64: 1, 128>}, {transform_indices = @transform_3, window_bounds = array<i64: 104, 128>}]} {
    %c0 = arith.constant 0 : index
    %c0_0 = arith.constant 0 : index
    %0 = vector.load %arg1[%c0, %c0_0] : memref<104x1xf32, #tpu.memory_space<vmem>>, vector<104x1xf32>
    %c0_1 = arith.constant 0 : index
    %c0_2 = arith.constant 0 : index
    %1 = vector.load %arg2[%c0_1, %c0_2] : memref<1x128xf32, #tpu.memory_space<vmem>>, vector<1x128xf32>
    %c0_3 = arith.constant 0 : index
    %c0_4 = arith.constant 0 : index
    %2 = vector.load %arg3[%c0_3, %c0_4] : memref<1x128xf32, #tpu.memory_space<vmem>>, vector<1x128xf32>
    %3 = vector.broadcast %0 : vector<104x1xf32> to vector<104x128xf32>
    %4 = vector.broadcast %1 : vector<1x128xf32> to vector<104x128xf32>
    %5 = arith.mulf %3, %4 : vector<104x128xf32>
    %6 = vector.broadcast %2 : vector<1x128xf32> to vector<104x128xf32>
    %7 = arith.addf %6, %5 : vector<104x128xf32>
    %8 = math.tanh %7 : vector<104x128xf32>
    %c0_5 = arith.constant 0 : index
    %c0_6 = arith.constant 0 : index
    %9 = vector.load %arg4[%c0_5, %c0_6] : memref<104x128xf32, #tpu.memory_space<vmem>>, vector<104x128xf32>
    tpu.vector_store %arg4[%c0_5, %c0_6], %8 {strides = array<i32>} : memref<104x128xf32, #tpu.memory_space<vmem>>, vector<104x128xf32>,
    return
  }
  func.func @transform_0(%arg0: i32) -> (i32, i32) {
    %c0_i32 = arith.constant 0 : i32
    %c0_i32_0 = arith.constant 0 : i32
    return %arg0, %c0_i32 : i32, i32
  }
  func.func @transform_1(%arg0: i32) -> (i32, i32) {
    %c0_i32 = arith.constant 0 : i32
    %c0_i32_0 = arith.constant 0 : i32
    %c0_i32_1 = arith.constant 0 : i32
    return %c0_i32, %c0_i32_0 : i32, i32
  }
  func.func @transform_2(%arg0: i32) -> (i32, i32) {
    %c0_i32 = arith.constant 0 : i32
    %c0_i32_0 = arith.constant 0 : i32
    %c0_i32_1 = arith.constant 0 : i32
    return %c0_i32, %c0_i32_0 : i32, i32
  }
  func.func @transform_3(%arg0: i32) -> (i32, i32) {
    %c0_i32 = arith.constant 0 : i32
    %c0_i32_0 = arith.constant 0 : i32
    return %arg0, %c0_i32 : i32, i32
  }
}

</mosaic_0001>

<bundles_post_ra>
// kernel: tpu_custom_call.1
= control target key start
LH: loop header
LB: loop body
LE: loop exit
PB: predicated region body
PF: predicated region fallthrough
CT: control target
= control target key end

     0   :  { %8 = vsyncpa [#allocation3], 0  ;;  %s777_s0 = inlined_call_operand.vmem [shape: f32[200,1], index: 0, kind: input, shape index: {}]   ;;  %s778_s1 = inlined_call_operand.vmem [shape: f32[1,128], index: 1, kind: input, shape index: {}]   ;;  %s779_s2 = inlined_call_operand.vmem [shape: f32[1,128], index: 2, kind: input, shape index: {}]   ;;  %s780_s3 = inlined_call_operand.hbm [shape: f32[200,128], index: 3, kind: output, shape index: {}]  }
   0x1   :  { %10 = vsyncpa [#allocation3 + $0x1], 0  ;;  %s604_s12 = smov 0   ;;  %s606_s13 = smov 0  }
   0x2   :  { %s608_s14 = smov 0   ;;  %s610_s15 = smov 0  }
   0x3 LB: > { %s625_s16 = sadd.s32 4294967295, %s578_s15   ;;  %s419_s17 = sadd.s32 4294967294, %s578_s15   ;;  %s578_s15 = sphi %s610_s15, %s787_s15   ;;  %s574_s14 = sphi %s608_s14, %s786_s14   ;;  %s570_s13 = sphi %s606_s13, %s785_s13   ;;  %s566_s12 = sphi %s604_s12, %s784_s12  }
   0x4   : > { %s629_s18 = sadd.s32 1, %s578_s15   ;;  %s91_s19 = sadd.s32 1, %s574_s14 }
   0x5   : > { %s88_s20 = ssub.s32 %s578_s15, %s629_s18  ;;  %p101_p0 = scmp.ne.s32.totalorder %s574_s14, %s570_s13 }
   0x6   : > { %p89_p1 = scmp.eq.s32.totalorder %s88_s20, 0  ;;  %p102_p2 = scmp.eq.s32.totalorder %s625_s16, 1 }
   0x7   : > { %p107_p3 = scmp.ne.s32.totalorder %s570_s13, %s566_s12  ;;  %p108_p4 = scmp.eq.s32.totalorder %s419_s17, 1 }
   0x8   : > { %s640_s21 = scalar_select %p89_p1, %s574_s14, %s91_s19  }
   0x9   : > { %p642_p5 = por %p102_p2, %p101_p0  ;;  %p646_p6 = por %p108_p4, %p107_p3 }
   0xa   : > { %p422_p7 = scmp.ge.s32.totalorder %s578_s15, 1  ;;  %p149_p8 = scmp.lt.s32.totalorder %s578_s15, 3 }
   0xc   : > { %p150_p9 = pnand %p422_p7, %p149_p8 }
   0xd   : > { %s653_s24 = smul.u32 (!%p150_p9), 13, %s625_s16  ;;  %s174_s25 = sand.u32 (!%p150_p9), 1, %s570_s13  }
   0xe   : > { %153 = sbr.rel (%p150_p9) target bundleno = 214 (0xd6), region = 32  ;;  %s716_s10 = scalar_lea.sflag (!%p150_p9), [#allocation3], %s174_s25 }
   0xf   : > { %p182_p10 = scmp.lt.s32.totalorder (!%p150_p9), %s653_s24, 24  ;;  %s432_s8 = smul.u32 (!%p150_p9), 104, %s174_s25 }
  0x11   : > { %s677_s9 = scalar_lea.vmem (!%p150_p9), [#allocation2], %s432_s8 }
  0x13   : > { %v580_v0 = vmov 0   ;;  %s183_s26 = scalar_select %p182_p10, %s653_s24, 24  ;;  %v664_v14 = vld [vmem:[%s778_s1] ss:$0 sm:$0xff] }
  0x14   : > { %475 = vset.pattern.permute.xlu1 %v580_v0  ;;  %474 = vset.pattern.permute.xlu0 %v580_v0  ;;  %v669_v16 = vld [vmem:[%s779_s2] ss:$0 sm:$0xff]  ;;  %s343_s11 = ssub.s32 (%p642_p5), 25, %s653_s24 }
  0x15   : > { %476 = vset.pattern.permute.xlu2 %v580_v0  ;;  %s423_s27 = sshll.u32 %s183_s26, 3  ;;  %p344_p11 = scmp.lt.s32.totalorder (%p642_p5), %s343_s11, 13 }
  0x16   : > { %s185_s30 = scalar_lea.vmem %s777_s0, %s423_s27 }
  0x17   : > { %v198_v1 = vld [vmem:[%s185_s30 + $0x10] sm:$0xff]  ;;  %v196_v2 = vld [vmem:[%s185_s30] sm:$0xff]  ;;  %v199_v4 = vld [vmem:[%s185_s30 + $0x18] sm:$0xff] }
  0x18   : > { %v200_v3 = vld [vmem:[%s185_s30 + $0x20] sm:$0xff]  ;;  %223 = vperm.xlu1 %475, %v198_v1   ;;  %213 = vperm.xlu0 %474, %v196_v2   ;;  %v197_v5 = vld [vmem:[%s185_s30 + $0x8] sm:$0xff]  ;;  %v203_v7 = vld [vmem:[%s185_s30 + $0x38] sm:$0xff] }
  0x19   : > { %233 = vperm.xlu2 %476, %v200_v3   ;;  %v201_v6 = vld [vmem:[%s185_s30 + $0x28] sm:$0xff]  ;;  %v202_v8 = vld [vmem:[%s185_s30 + $0x30] sm:$0xff]  ;;  %v204_v9 = vld [vmem:[%s185_s30 + $0x40] sm:$0xff] }
  0x1a   : > { %v206_v10 = vld [vmem:[%s185_s30 + $0x50] sm:$0xff]  ;;  %v205_v11 = vld [vmem:[%s185_s30 + $0x48] sm:$0xff]  ;;  %v207_v12 = vld [vmem:[%s185_s30 + $0x58] sm:$0xff] }
  0x1b   : > { %v208_v13 = vld [vmem:[%s185_s30 + $0x60] sm:$0xff] }
  0x20   : > { %228 = vperm.xlu1 %475, %v199_v4   ;;  %218 = vperm.xlu0 %474, %v197_v5  }
  0x21   : > { %238 = vperm.xlu2 %476, %v201_v6  }
  0x28   : > { %248 = vperm.xlu1 %475, %v203_v7   ;;  %243 = vperm.xlu0 %474, %v202_v8  }
  0x29   : > { %253 = vperm.xlu2 %476, %v204_v9  }
  0x30   : > { %263 = vperm.xlu1 %475, %v206_v10   ;;  %258 = vperm.xlu0 %474, %v205_v11  }
  0x31   : > { %268 = vperm.xlu2 %476, %v207_v12  }
  0x38   : > { %273 = vperm.xlu0 %474, %v208_v13  }
  0x73   : > { %v234_v15 = vpop.permute.xlu2 %233 }
  0x74   : > { %v283_v17 = vmul.f32 %v664_v14, %v234_v15 }
  0x76   : > { %v299_v18 = vadd.f32 %v669_v16, %v283_v17 }
  0x78   : > { %479 = vtanh.f32 %v299_v18 }
  0x7b   : > { %v239_v19 = vpop.permute.xlu2 %238 }
  0x7c   : > { %v284_v20 = vmul.f32 %v664_v14, %v239_v19 }
  0x7e   : > { %v480_v21 = vpop.eup %479  ;;  %v300_v22 = vadd.f32 %v669_v16, %v284_v20 }
  0x7f   : > { %325 = vst [vmem:[%s677_s9 + $0x20] sm:$0xff] %v480_v21 }
  0x80   : > { %481 = vtanh.f32 %v300_v22 }
  0x83   : > { %v254_v23 = vpop.permute.xlu2 %253 }
  0x84   : > { %v287_v24 = vmul.f32 %v664_v14, %v254_v23 }
  0x86   : > { %v482_v25 = vpop.eup %481  ;;  %v303_v26 = vadd.f32 %v669_v16, %v287_v24 }
  0x87   : > { %326 = vst [vmem:[%s677_s9 + $0x28] sm:$0xff] %v482_v25 }
  0x88   : > { %483 = vtanh.f32 %v303_v26 }
  0x8a   : > { %v224_v27 = vpop.permute.xlu1 %223  ;;  %v214_v28 = vpop.permute.xlu0 %213 }
  0x8b   : > { %v281_v29 = vmul.f32 %v664_v14, %v224_v27  ;;  %v279_v30 = vmul.f32 %v664_v14, %v214_v28  ;;  %v269_v31 = vpop.permute.xlu2 %268 }
  0x8c   : > { %v290_v32 = vmul.f32 %v664_v14, %v269_v31 }
  0x8d   : > { %v297_v33 = vadd.f32 %v669_v16, %v281_v29  ;;  %v295_v34 = vadd.f32 %v669_v16, %v279_v30 }
  0x8e   : > { %v484_v35 = vpop.eup %483  ;;  %v306_v36 = vadd.f32 %v669_v16, %v290_v32 }
  0x8f   : > { %329 = vst [vmem:[%s677_s9 + $0x40] sm:$0xff] %v484_v35  ;;  %485 = vtanh.f32 %v297_v33 }
  0x90   : > { %487 = vtanh.f32 %v295_v34 }
  0x91   : > { %489 = vtanh.f32 %v306_v36 }
  0x92   : > { %v229_v37 = vpop.permute.xlu1 %228  ;;  %v219_v38 = vpop.permute.xlu0 %218 }
  0x93   : > { %v282_v39 = vmul.f32 %v664_v14, %v229_v37  ;;  %v280_v40 = vmul.f32 %v664_v14, %v219_v38 }
  0x95   : > { %v486_v41 = vpop.eup %485  ;;  %v298_v42 = vadd.f32 %v669_v16, %v282_v39  ;;  %v296_v43 = vadd.f32 %v669_v16, %v280_v40 }
  0x96   : > { %v488_v44 = vpop.eup %487  ;;  %323 = vst [vmem:[%s677_s9 + $0x10] sm:$0xff] %v486_v41 }
  0x97   : > { %v490_v45 = vpop.eup %489  ;;  %321 = vst [vmem:[%s677_s9] sm:$0xff] %v488_v44  ;;  %491 = vtanh.f32 %v298_v42 }
  0x98   : > { %332 = vst [vmem:[%s677_s9 + $0x58] sm:$0xff] %v490_v45  ;;  %493 = vtanh.f32 %v296_v43 }
  0x9a   : > { %v249_v46 = vpop.permute.xlu1 %248  ;;  %v244_v47 = vpop.permute.xlu0 %243 }
  0x9b   : > { %v286_v48 = vmul.f32 %v664_v14, %v249_v46  ;;  %v285_v49 = vmul.f32 %v664_v14, %v244_v47 }
  0x9d   : > { %v492_v50 = vpop.eup %491  ;;  %v302_v51 = vadd.f32 %v669_v16, %v286_v48  ;;  %v301_v52 = vadd.f32 %v669_v16, %v285_v49 }
  0x9e   : > { %v494_v53 = vpop.eup %493  ;;  %324 = vst [vmem:[%s677_s9 + $0x18] sm:$0xff] %v492_v50 }
  0x9f   : > { %322 = vst [vmem:[%s677_s9 + $0x8] sm:$0xff] %v494_v53  ;;  %495 = vtanh.f32 %v302_v51 }
  0xa0   : > { %497 = vtanh.f32 %v301_v52 }
  0xa2   : > { %v264_v54 = vpop.permute.xlu1 %263  ;;  %v259_v55 = vpop.permute.xlu0 %258 }
  0xa3   : > { %v289_v56 = vmul.f32 %v664_v14, %v264_v54  ;;  %v288_v57 = vmul.f32 %v664_v14, %v259_v55 }
  0xa5   : > { %v496_v58 = vpop.eup %495  ;;  %v305_v59 = vadd.f32 %v669_v16, %v289_v56  ;;  %v304_v60 = vadd.f32 %v669_v16, %v288_v57 }
  0xa6   : > { %v498_v61 = vpop.eup %497  ;;  %328 = vst [vmem:[%s677_s9 + $0x38] sm:$0xff] %v496_v58 }
  0xa7   : > { %327 = vst [vmem:[%s677_s9 + $0x30] sm:$0xff] %v498_v61  ;;  %499 = vtanh.f32 %v305_v59 }
  0xa8   : > { %501 = vtanh.f32 %v304_v60 }
  0xaa   : > { %v274_v62 = vpop.permute.xlu0 %273 }
  0xab   : > { %v291_v63 = vmul.f32 %v664_v14, %v274_v62 }
  0xad   : > { %v500_v0 = vpop.eup %499  ;;  %v307_v1 = vadd.f32 %v669_v16, %v291_v63 }
  0xae   : > { %v502_v2 = vpop.eup %501  ;;  %331 = vst [vmem:[%s677_s9 + $0x50] sm:$0xff] %v500_v0 }
  0xaf   : > { %330 = vst [vmem:[%s677_s9 + $0x48] sm:$0xff] %v502_v2  ;;  %503 = vtanh.f32 %v307_v1 }
  0xb2   : > { %341 = sbr.rel (!%p642_p5) target bundleno = 214 (0xd6), region = 36 }
  0xb5   : > { %v504_v3 = vpop.eup %503 }
  0xb6   : > { %333 = vst [vmem:[%s677_s9 + $0x60] sm:$0xff] %v504_v3 }
  0xb7   : > { %s789_s11 = smov (!%p344_p11, %s343_s11), 13 }
  0xb8   : > { %s424_s17 = sshll.u32 %s789_s11, 3 }
  0xb9   : > { %s347_s19 = ssub.s32 104, %s424_s17 }
  0xba   : > { %s348_s20 = sshll.u32 %s347_s19, 4 }
  0xbb   : > { %349 = vsyncadd %s716_s10, %s348_s20  ;;  %p725_p12 = scmp.ne.s32.totalorder %s424_s17, 0  ;;  %s431_s22 = smul.u32 104, %s625_s16 }
  0xbc   : > { %s354_s26 = sshll.u32 %s677_s9, 4  ;;  %s428_s24 = sshll.u32 %s789_s11, 7  ;;  %s735_s26 = int_to_ptr.vmem [resolvable:$true] %s354_s26 }
  0xbd   : > { %s352_s29 = scalar_lea.hbm %s780_s3, %s431_s22  ;;  %s505_s4 = sshra.s32 %s735_s26, 4  ;;  %s506_s4 = int_to_ptr.vmem [resolvable:$true] %s505_s4 }
  0xbe   : > { %s356_s30 = sshll.u32 %s352_s29, 4  ;;  %s507_s5 = sshrl.u32 %s428_s24, 4  ;;  %s737_s30 = int_to_ptr.hbm [resolvable:$true] %s356_s30 }
  0xbf   : > { %s512_s6 = scalar_lea.vmem %s506_s4, %s507_s5  ;;  %s581_s16 = smov [#allocation2]  }
  0xc0   : > { %p513_p13 = scmp.ne.s32.totalorder %s506_s4, %s512_s6  ;;  %s516_s7 = scalar_lea.vmem %s581_s16, 208 }
  0xc1   : > { %p518_p2 = scmp.lt.s32.totalorder %s516_s7, %s512_s6 }
  0xc2   : > { %p514_p0 = pnand %p513_p13, %p725_p12 }
  0xc4   : > { %p515_p1 = pneg %p514_p0 }
  0xc6   : > { %p520_p3 = pnand %p518_p2, %p515_p1 }
  0xc8   : > { %523 = shalt.err (!%p520_p3)
}
  0xc9   : > { %s524_s8 = sshra.s32 %s737_s30, 4  ;;  %s535_s20 = scalar_lea.hbm %s780_s3, 200  ;;  %s525_s8 = int_to_ptr.hbm [resolvable:$true] %s524_s8 }
  0xca   : > { %s531_s9 = scalar_lea.hbm %s525_s8, %s507_s5  ;;  %p536_p8 = scmp.lt.s32.totalorder %s525_s8, %s780_s3 }
  0xcb   : > { %p532_p4 = scmp.ne.s32.totalorder %s525_s8, %s531_s9  ;;  %p537_p9 = scmp.lt.s32.totalorder %s535_s20, %s531_s9 }
  0xcd   : > { %p533_p5 = pnand %p532_p4, %p725_p12  ;;  %p538_p10 = por %p537_p9, %p536_p8 }
  0xcf   : > { %p534_p7 = pneg %p533_p5 }
  0xd1   : > { %p539_p11 = pnand %p538_p10, %p534_p7 }
  0xd3   : > { %542 = shalt.err (!%p539_p11)
}
  0xd4   : > { %s582_s28 = smov 128   ;;  %s583_s29 = smov 8  }
  0xd5   : > { %362 = dma.vmem_to_hbm [thread:$0]  (%p725_p12), %s735_s26, %s428_s24, %s737_s30, %s716_s10, %s582_s28, %s582_s28, %s583_s29  }
  0xd6 PF: > { %p438_p13 = scmp.ge.s32.totalorder %s578_s15, 2  ;;  %s371_s4 = sand.u32 1, %s566_s12  }
  0xd7   : > { %s372_s5 = scalar_lea.sflag [#allocation3], %s371_s4 }
  0xd8   : > { %p435_p0 = pnand %p438_p13, %p646_p6 }
  0xda   : > { %p436_p1 = pneg %p435_p0 }
  0xdc   : > { %561 = dma.done.wait (%p436_p1), %s372_s5, 1664  }
  0xdd   : > { %563 = vsyncadd (%p436_p1), %s372_s5, 4294965632  ;;  %p13_p2 = scmp.ge.s32.totalorder %s629_s18, 4   ;;  %s784_s12 = smov %s570_s13 }
  0xde   : > { %s785_s13 = smov %s574_s14  ;;  %s786_s14 = smov %s640_s21 }
  0xdf   : > { %s787_s15 = smov %s629_s18  ;;  %15 = sbr.rel (!%p13_p2) target bundleno = 3 (0x3), region = 67 }
  0xe4   :  { %378 = vsyncpa [#allocation3], 1 }
  0xe5   :  { %380 = vsyncpa [#allocation3 + $0x1], 1 }

</bundles_post_ra>
